<compile_context>
chip_gen: v7x
topology: tpu7x:2x2x1
jax: 0.10.0
libtpu: 0.0.40
codegen_flags: <defaults>
</compile_context>

<pallas_src>
import functools

import jax
import jax.numpy as jnp
from jax.experimental import pallas as pl
from jax.experimental.pallas import tpu as pltpu


def _static_pow(x, p):
    """x ** p with a static exponent; strength-reduce small integer powers."""
    p = float(p)
    if p == 1.0:
        return x
    if p.is_integer() and 0.0 <= p <= 8.0:
        n_exp = int(p)
        if n_exp == 0:
            return jnp.ones_like(x)
        r = x
        for _ in range(n_exp - 1):
            r = r * x                      # VPU multiplies, keeps EUP free
        return r
    return x ** p                          # generic pow fallback (EUP)


def _focal_loss_kernel(*refs, c, tile, hw, gamma, power, has_weight):
    # refs: x_ref (1,C,T), t_ref (1,1,T), [w_ref (1,1,T)], o_ref (1,1,T)
    if has_weight:
        x_ref, t_ref, w_ref, o_ref = refs
    else:
        x_ref, t_ref, o_ref = refs

    j = pl.program_id(1)

    @pl.when(j == 0)
    def _():
        o_ref[...] = jnp.zeros_like(o_ref)

    x = x_ref[0].astype(jnp.float32)                       # (C, T)

    # --- shared softmax / log_softmax over the channel (sublane) axis -------
    m = jnp.max(x, axis=0, keepdims=True)                  # (1, T)
    xs = x - m
    e = jnp.exp(xs)                                        # single exp pass
    s = jnp.sum(e, axis=0, keepdims=True)                  # (1, T)
    log_p = xs - jnp.log(s)                                # log_softmax (C, T)
    sm = e * pl.reciprocal(s)                              # softmax     (C, T)

    # focal modulation (1 - p)^gamma; integer gamma -> VPU multiplies only
    base = jnp.maximum(1.0 - sm, 0.0)                      # guard pow(neg, frac)
    dweight = _static_pow(base, gamma)                     # (C, T)

    # pick the target-class term without materializing a one-hot
    tgt = jnp.clip(t_ref[0], 0, c - 1)                     # (1, T) int32
    class_ids = jax.lax.broadcasted_iota(jnp.int32, (c, tile), 0)
    contrib = jnp.where(class_ids == tgt, log_p * dweight, 0.0)   # (C, T)
    logpy = jnp.sum(contrib, axis=0, keepdims=True)        # (1, T)

    if has_weight:
        wv = w_ref[0].astype(jnp.float32)                  # (1, T)
        logpy = logpy * _static_pow(wv, power)

    # mask lanes that fall in the spatial padding (static: only when padded)
    if hw % tile != 0:
        pos = j * tile + jax.lax.broadcasted_iota(jnp.int32, (1, tile), 1)
        logpy = jnp.where(pos < hw, logpy, 0.0)

    # lane-wide partial-sum accumulator, resident in VMEM across the j axis
    o_ref[0] += logpy


def _crop(w, h, target):
    # center-crop (N, Ht, Wt) -> (N, h, w), mirroring the PyTorch crop()
    _, ht, wt = target.shape
    off_w, off_h = (wt - w) // 2, (ht - h) // 2
    if off_w > 0 and off_h > 0:
        target = target[:, off_h:-off_h, off_w:-off_w]
    return target


def weighted_focal_loss_2d(inp, target, weight=None, gamma=2, power=1,
                           max_tile=4096):
    """Forward pass of WeightedFocalLoss2d.

    inp: (N, C, H, W) float logits; target: (N, Ht, Wt) int labels;
    weight: optional (N, Ht, Wt) float per-pixel weights.
    """
    n, c, h, w = inp.shape
    hw = h * w

    target = _crop(w, h, target)
    has_weight = weight is not None
    if has_weight:
        weight = _crop(w, h, weight)

    # spatial tile: multiple of 128 lanes, capped at max_tile
    lane = 128
    tile = min(max_tile, lane * pl.cdiv(hw, lane))
    num_tiles = pl.cdiv(hw, tile)
    hw_pad = num_tiles * tile
    pad = hw_pad - hw

    x2 = inp.reshape(n, c, hw)
    t2 = target.reshape(n, 1, hw).astype(jnp.int32)
    if pad:
        x2 = jnp.pad(x2, ((0, 0), (0, 0), (0, pad)))
        t2 = jnp.pad(t2, ((0, 0), (0, 0), (0, pad)))

    operands = [x2, t2]
    in_specs = [
        pl.BlockSpec((1, c, tile), lambda i, j: (i, 0, j)),
        pl.BlockSpec((1, 1, tile), lambda i, j: (i, 0, j)),
    ]
    if has_weight:
        w2 = weight.reshape(n, 1, hw).astype(jnp.float32)
        if pad:
            w2 = jnp.pad(w2, ((0, 0), (0, 0), (0, pad)))
        operands.append(w2)
        in_specs.append(pl.BlockSpec((1, 1, tile), lambda i, j: (i, 0, j)))

    kernel = functools.partial(
        _focal_loss_kernel, c=c, tile=tile, hw=hw,
        gamma=float(gamma), power=float(power), has_weight=has_weight)

    partial_sums = pl.pallas_call(
        kernel,
        out_shape=jax.ShapeDtypeStruct((n, 1, tile), jnp.float32),
        grid_spec=pltpu.PrefetchScalarGridSpec(
            num_scalar_prefetch=0,
            grid=(n, num_tiles),
            in_specs=in_specs,
            out_specs=pl.BlockSpec((1, 1, tile), lambda i, j: (i, 0, 0)),
        ),
        compiler_params=pltpu.CompilerParams(
            dimension_semantics=("parallel", "arbitrary")),
    )(*operands)

    # loss = -mean(logpy) over all N*H*W pixels (padding lanes contribute 0)
    return -jnp.sum(partial_sums) / (n * h * w)


def _reference_loss(inp, target, weight=None, gamma=2, power=1):
    # Pure-JAX reference replicating the PyTorch forward semantics.
    n, c, h, w = inp.shape
    log_p = jax.nn.log_softmax(inp, axis=1)
    tgt = jnp.clip(target, 0, c - 1)
    ymask = jax.nn.one_hot(tgt, c, axis=1, dtype=jnp.float32)     # (N,C,H,W)
    if weight is not None:
        ymask = ymask * (weight[:, None, :, :] ** power)
    dweight = (1.0 - jax.nn.softmax(inp, axis=1)) ** gamma
    logpy = jnp.sum(log_p * ymask * dweight, axis=1)
    return -jnp.mean(logpy)


if __name__ == "__main__":
    key = jax.random.PRNGKey(0)
    k1, k2, k3, k4, k5, k6 = jax.random.split(key, 6)

    # case 1: default gamma=2, power=1, with pixel weights
    N, C, H, W = 2, 4, 16, 16
    x = jax.random.normal(k1, (N, C, H, W), dtype=jnp.float32)
    target = jax.random.randint(k2, (N, H, W), 0, C, dtype=jnp.int32)
    weight = jax.random.uniform(k3, (N, H, W), dtype=jnp.float32)

    loss = jax.block_until_ready(weighted_focal_loss_2d(x, target, weight))
    ref = _reference_loss(x, target, weight)
    assert jnp.allclose(loss, ref, atol=1e-5, rtol=1e-4), (loss, ref)

    # case 2: weight=None path (no weight operand at all)
    loss_nw = jax.block_until_ready(weighted_focal_loss_2d(x, target, None))
    ref_nw = _reference_loss(x, target, None)
    assert jnp.allclose(loss_nw, ref_nw, atol=1e-5, rtol=1e-4), (loss_nw, ref_nw)

    # case 3: spatial size not a multiple of 128 (exercises padded-lane mask),
    #         integer gamma=3 and power=2 (strength-reduced pow paths)
    N2, C2, H2, W2 = 2, 5, 10, 12
    x3 = jax.random.normal(k4, (N2, C2, H2, W2), dtype=jnp.float32)
    t3 = jax.random.randint(k5, (N2, H2, W2), 0, C2, dtype=jnp.int32)
    w3 = jax.random.uniform(k6, (N2, H2, W2), dtype=jnp.float32)

    loss_p = jax.block_until_ready(
        weighted_focal_loss_2d(x3, t3, w3, gamma=3, power=2))
    ref_p = _reference_loss(x3, t3, w3, gamma=3, power=2)
    assert jnp.allclose(loss_p, ref_p, atol=1e-5, rtol=1e-4), (loss_p, ref_p)

    # case 4: non-integer gamma (generic pow fallback inside the kernel)
    loss_f = jax.block_until_ready(
        weighted_focal_loss_2d(x3, t3, w3, gamma=1.5, power=1))
    ref_f = _reference_loss(x3, t3, w3, gamma=1.5, power=1)
    assert jnp.allclose(loss_f, ref_f, atol=1e-5, rtol=1e-4), (loss_f, ref_f)

    print("KERNEL_OK")
</pallas_src>

<mosaic_0001>
module attributes {stable_mosaic.version = 11 : i64} {
  func.func @_focal_loss_kernel(%arg0: i32, %arg1: i32, %arg2: memref<1x4x256xf32, #tpu.memory_space<vmem>>, %arg3: memref<1x1x256xi32, #tpu.memory_space<vmem>>, %arg4: memref<1x1x256xf32, #tpu.memory_space<vmem>>, %arg5: memref<1x1x256xf32, #tpu.memory_space<vmem>>) attributes {dimension_semantics = [#tpu.dimension_semantics<parallel>, #tpu.dimension_semantics<arbitrary>], iteration_bounds = array<i64: 2, 1>, scalar_prefetch = 0 : i64, scratch_operands = 0 : i64, tpu.core_type = #tpu.core_type<tc>, window_params = [{transform_indices = @transform_0, window_bounds = array<i64: 1, 4, 256>}, {transform_indices = @transform_1, window_bounds = array<i64: 1, 1, 256>}, {transform_indices = @transform_2, window_bounds = array<i64: 1, 1, 256>}, {transform_indices = @transform_3, window_bounds = array<i64: 1, 1, 256>}]} {
    %c0_i32 = arith.constant 0 : i32
    %0 = arith.cmpi eq, %arg1, %c0_i32 : i32
    %1 = arith.extui %0 : i1 to i32
    %c0_i32_0 = arith.constant 0 : i32
    %2 = arith.cmpi ne, %1, %c0_i32_0 : i32
    scf.if %2 {
      %cst_21 = arith.constant 0.000000e+00 : f32
      %46 = vector.broadcast %cst_21 : f32 to vector<1x1x256xf32>
      %c0_22 = arith.constant 0 : index
      %c0_23 = arith.constant 0 : index
      %c0_24 = arith.constant 0 : index
      %47 = vector.load %arg5[%c0_22, %c0_23, %c0_24] : memref<1x1x256xf32, #tpu.memory_space<vmem>>, vector<1x1x256xf32>
      tpu.vector_store %arg5[%c0_22, %c0_23, %c0_24], %46 {strides = array<i32>} : memref<1x1x256xf32, #tpu.memory_space<vmem>>, vector<1x1x256xf32>,
    } else {
    }
    %c0 = arith.constant 0 : index
    %c0_1 = arith.constant 0 : index
    %c0_2 = arith.constant 0 : index
    %3 = vector.load %arg2[%c0, %c0_1, %c0_2] : memref<1x4x256xf32, #tpu.memory_space<vmem>>, vector<1x4x256xf32>
    %4 = vector.shape_cast %3 : vector<1x4x256xf32> to vector<4x256xf32>
    %cst = arith.constant dense<0xFF800000> : vector<256xf32>
    %5 = vector.multi_reduction <maximumf>, %4, %cst [0] : vector<4x256xf32> to vector<256xf32>
    %6 = vector.shape_cast %5 : vector<256xf32> to vector<1x256xf32>
    %7 = vector.broadcast %6 : vector<1x256xf32> to vector<4x256xf32>
    %8 = arith.subf %4, %7 : vector<4x256xf32>
    %9 = math.exp %8 : vector<4x256xf32>
    %cst_3 = arith.constant dense<0.000000e+00> : vector<256xf32>
    %10 = vector.multi_reduction <add>, %9, %cst_3 [0] : vector<4x256xf32> to vector<256xf32>
    %11 = vector.shape_cast %10 : vector<256xf32> to vector<1x256xf32>
    %12 = math.log %11 : vector<1x256xf32>
    %13 = vector.broadcast %12 : vector<1x256xf32> to vector<4x256xf32>
    %14 = arith.subf %8, %13 : vector<4x256xf32>
    %15 = tpu.reciprocal %11 : vector<1x256xf32> -> vector<1x256xf32>
    %16 = vector.broadcast %15 : vector<1x256xf32> to vector<4x256xf32>
    %17 = arith.mulf %9, %16 : vector<4x256xf32>
    %cst_4 = arith.constant 1.000000e+00 : f32
    %18 = vector.broadcast %cst_4 : f32 to vector<4x256xf32>
    %19 = arith.subf %18, %17 : vector<4x256xf32>
    %cst_5 = arith.constant 0.000000e+00 : f32
    %20 = vector.broadcast %cst_5 : f32 to vector<4x256xf32>
    %21 = arith.maximumf %19, %20 : vector<4x256xf32>
    %22 = arith.mulf %21, %21 : vector<4x256xf32>
    %c0_6 = arith.constant 0 : index
    %c0_7 = arith.constant 0 : index
    %c0_8 = arith.constant 0 : index
    %23 = vector.load %arg3[%c0_6, %c0_7, %c0_8] : memref<1x1x256xi32, #tpu.memory_space<vmem>>, vector<1x1x256xi32>
    %24 = vector.shape_cast %23 : vector<1x1x256xi32> to vector<1x256xi32>
    %c0_i32_9 = arith.constant 0 : i32
    %c3_i32 = arith.constant 3 : i32
    %25 = vector.broadcast %c0_i32_9 : i32 to vector<1x256xi32>
    %26 = arith.maxsi %25, %24 : vector<1x256xi32>
    %27 = vector.broadcast %c3_i32 : i32 to vector<1x256xi32>
    %28 = arith.minsi %27, %26 : vector<1x256xi32>
    %29 = tpu.iota {dimensions = array<i32: 0>} : vector<4x256xi32>
    %30 = vector.broadcast %28 : vector<1x256xi32> to vector<4x256xi32>
    %31 = arith.cmpi eq, %29, %30 : vector<4x256xi32>
    %32 = arith.mulf %14, %22 : vector<4x256xf32>
    %cst_10 = arith.constant 0.000000e+00 : f32
    %33 = vector.broadcast %cst_10 : f32 to vector<4x256xf32>
    %34 = arith.select %31, %32, %33 : vector<4x256xi1>, vector<4x256xf32>
    %cst_11 = arith.constant dense<0.000000e+00> : vector<256xf32>
    %35 = vector.multi_reduction <add>, %34, %cst_11 [0] : vector<4x256xf32> to vector<256xf32>
    %36 = vector.shape_cast %35 : vector<256xf32> to vector<1x256xf32>
    %c0_12 = arith.constant 0 : index
    %c0_13 = arith.constant 0 : index
    %c0_14 = arith.constant 0 : index
    %37 = vector.load %arg4[%c0_12, %c0_13, %c0_14] : memref<1x1x256xf32, #tpu.memory_space<vmem>>, vector<1x1x256xf32>
    %38 = vector.shape_cast %37 : vector<1x1x256xf32> to vector<1x256xf32>
    %39 = arith.mulf %36, %38 : vector<1x256xf32>
    %c0_15 = arith.constant 0 : index
    %c0_16 = arith.constant 0 : index
    %c0_17 = arith.constant 0 : index
    %40 = vector.load %arg5[%c0_15, %c0_16, %c0_17] : memref<1x1x256xf32, #tpu.memory_space<vmem>>, vector<1x1x256xf32>
    %41 = vector.shape_cast %40 : vector<1x1x256xf32> to vector<1x256xf32>
    %42 = arith.addf %41, %39 : vector<1x256xf32>
    %c0_18 = arith.constant 0 : index
    %c0_19 = arith.constant 0 : index
    %c0_20 = arith.constant 0 : index
    %43 = vector.load %arg5[%c0_18, %c0_19, %c0_20] : memref<1x1x256xf32, #tpu.memory_space<vmem>>, vector<1x1x256xf32>
    %44 = vector.shape_cast %43 : vector<1x1x256xf32> to vector<1x256xf32>
    %45 = vector.shape_cast %42 : vector<1x256xf32> to vector<1x1x256xf32>
    tpu.vector_store %arg5[%c0_18, %c0_19, %c0_20], %45 {strides = array<i32>} : memref<1x1x256xf32, #tpu.memory_space<vmem>>, vector<1x1x256xf32>,
    return
  }
  func.func @transform_0(%arg0: i32, %arg1: i32) -> (i32, i32, i32) {
    %c0_i32 = arith.constant 0 : i32
    %c0_i32_0 = arith.constant 0 : i32
    return %arg0, %c0_i32, %arg1 : i32, i32, i32
  }
  func.func @transform_1(%arg0: i32, %arg1: i32) -> (i32, i32, i32) {
    %c0_i32 = arith.constant 0 : i32
    %c0_i32_0 = arith.constant 0 : i32
    return %arg0, %c0_i32, %arg1 : i32, i32, i32
  }
  func.func @transform_2(%arg0: i32, %arg1: i32) -> (i32, i32, i32) {
    %c0_i32 = arith.constant 0 : i32
    %c0_i32_0 = arith.constant 0 : i32
    return %arg0, %c0_i32, %arg1 : i32, i32, i32
  }
  func.func @transform_3(%arg0: i32, %arg1: i32) -> (i32, i32, i32) {
    %c0_i32 = arith.constant 0 : i32
    %c0_i32_0 = arith.constant 0 : i32
    %c0_i32_1 = arith.constant 0 : i32
    return %arg0, %c0_i32, %c0_i32_0 : i32, i32, i32
  }
}

</mosaic_0001>

<bundles_post_ra>
// kernel: tpu_custom_call.1
= control target key start
LH: loop header
LB: loop body
LE: loop exit
PB: predicated region body
PF: predicated region fallthrough
CT: control target
= control target key end

     0   :  { %8 = vsyncpa [#allocation3], 0  ;;  %s1083_s0 = inlined_call_operand.hbm [shape: f32[2,4,256], index: 0, kind: input, shape index: {}]   ;;  %s1084_s1 = inlined_call_operand.hbm [shape: s32[2,1,256], index: 1, kind: input, shape index: {}]   ;;  %s1085_s2 = inlined_call_operand.vmem [shape: f32[2,1,256], index: 2, kind: input, shape index: {}]   ;;  %s1086_s3 = inlined_call_operand.hbm [shape: f32[2,1,256], index: 3, kind: output, shape index: {}]  }
   0x1   :  { %10 = vsyncpa [#allocation3 + $0x1], 0 }
   0x2   :  { %11 = vsyncpa [#allocation6], 0 }
   0x3   :  { %13 = vsyncpa [#allocation6 + $0x1], 0 }
   0x4   :  { %14 = vsyncpa [#allocation4], 0 }
   0x5   :  { %16 = vsyncpa [#allocation4 + $0x1], 0  ;;  %s840_s12 = smov 0   ;;  %s842_s13 = smov 0  }
   0x6   :  { %s844_s14 = smov 0   ;;  %s846_s15 = smov 0  }
   0x7   :  { %s848_s16 = smov 0   ;;  %s850_s17 = smov 0  }
   0x8 LB: > { %s564_s18 = sadd.s32 4294967295, %s813_s17   ;;  %s565_s19 = sadd.s32 4294967294, %s813_s17   ;;  %s813_s17 = sphi %s850_s17, %s22_s17   ;;  %s809_s16 = sphi %s848_s16, %s1108_s16   ;;  %s805_s15 = sphi %s846_s15, %s1107_s15   ;;  %s801_s14 = sphi %s844_s14, %s1106_s14   ;;  %s797_s13 = sphi %s842_s13, %s1105_s13   ;;  %s793_s12 = sphi %s840_s12, %s1104_s12  }
   0x9   : > { %s34_s20 = sadd.s32 1, %s809_s16  ;;  %s43_s21 = sadd.s32 1, %s801_s14 }
   0xa   : > { %p36_p0 = scmp.ge.s32.totalorder %s34_s20, 2  ;;  %p50_p1 = scmp.ne.s32.totalorder %s801_s14, %s797_s13 }
   0xb   : > { %p51_p2 = scmp.eq.s32.totalorder %s813_s17, 0  ;;  %p56_p3 = scmp.ne.s32.totalorder %s797_s13, %s793_s12 }
   0xc   : > { %s1110_s20 = smov (%p36_p0, %s34_s20), 0  ;;  %p57_p5 = scmp.eq.s32.totalorder %s564_s18, 0 }
   0xd   : > { %p881_p4 = por %p51_p2, %p50_p1  ;;  %s38_s23 = ssub.s32 %s809_s16, %s1110_s20 }
   0xe   : > { %p136_p6 = scmp.eq.s32.totalorder %s564_s18, 1  ;;  %p41_p7 = scmp.eq.s32.totalorder %s38_s23, 0 }
   0xf   : > { %p887_p8 = por %p57_p5, %p56_p3  ;;  %p142_p10 = scmp.eq.s32.totalorder %s565_s19, 1 }
  0x10   : > { %p891_p9 = por %p136_p6, %p50_p1  ;;  %p604_p13 = scmp.lt.s32.totalorder %s813_s17, 2 }
  0x11   : > { %s1090_s24 = scalar_select %p887_p8, 1, 0 }
  0x12   : > { %s1091_s25 = scalar_select %p891_p9, 1, 0 }
  0x13   : > { %s896_s26 = scalar_select %p41_p7, %s801_s14, %s43_s21  }
  0x14   : > { %p898_p11 = por %p142_p10, %p56_p3  ;;  %s905_s28 = sand.u32 1, %s801_s14  }
  0x15   : > { %s568_s29 = sshll.u32 %s905_s28, 3  ;;  %s584_s30 = sshll.u32 %s809_s16, 7 }
  0x16   : > { %s1092_s27 = scalar_select %p898_p11, 1, 0 }
  0x17   : > { %s912_s6 = scalar_lea.hbm %s1083_s0, %s584_s30  ;;  %s166_s7 = scalar_lea.vmem [#allocation2], %s568_s29 }
  0x18   : > { %s176_s8 = sshll.u32 %s166_s7, 4  ;;  %p918_p0 = pnand %p604_p13, %p881_p4  ;;  %s914_s8 = int_to_ptr.vmem [resolvable:$true] %s176_s8 }
  0x19   : > { %s163_s10 = scalar_lea.sflag [#allocation3], %s905_s28  ;;  %s667_s11 = scalar_lea.hbm %s912_s6, 128 }
  0x1a   : > { %p668_p3 = scmp.ne.s32.totalorder %s912_s6, %s667_s11  ;;  %p669_p5 = pneg %p918_p0 }
  0x1b   : > { %s672_s21 = scalar_lea.hbm %s1083_s0, 256  ;;  %p673_p4 = scmp.lt.u32.totalorder %s912_s6, %s1083_s0 }
  0x1c   : > { %p670_p6 = pnand %p669_p5, %p668_p3  ;;  %p674_p10 = scmp.lt.u32.totalorder %s672_s21, %s667_s11 }
  0x1d   : > { %p676_p12 = scmp.lt.u32.totalorder %s667_s11, %s912_s6 }
  0x1e   : > { %p671_p7 = pneg %p670_p6  ;;  %p675_p13 = por %p674_p10, %p673_p4 }
  0x20   : > { %p677_p1 = por %p676_p12, %p675_p13 }
  0x22   : > { %p678_p2 = pnand %p677_p1, %p671_p7 }
  0x24   : > { %681 = shalt.err (!%p678_p2)
}
  0x25   : > { %s682_s29 = scalar_lea.vmem %s914_s8, 128  ;;  %s815_s30 = smov [#allocation2]  }
  0x26   : > { %p683_p3 = scmp.ne.s32.totalorder %s914_s8, %s682_s29  ;;  %s687_s4 = sshll.u32 %s815_s30, 4  ;;  %s688_s4 = int_to_ptr.vmem [resolvable:$false] %s687_s4 }
  0x27   : > { %s689_s5 = scalar_lea.vmem %s688_s4, 256  ;;  %p690_p9 = scmp.lt.s32.totalorder %s914_s8, %s688_s4 }
  0x28   : > { %p685_p6 = pnand %p683_p3, %p669_p5  ;;  %p691_p4 = scmp.lt.s32.totalorder %s689_s5, %s682_s29 }
  0x2a   : > { %p686_p11 = pneg %p685_p6  ;;  %p692_p10 = por %p691_p4, %p690_p9 }
  0x2c   : > { %p693_p12 = pnand %p692_p10, %p686_p11 }
  0x2e   : > { %696 = shalt.err (!%p693_p12)
}
  0x2f   : > { %596 = dma.hbm_to_vmem [thread:$0]  (!%p918_p0), %s912_s6, 128, %s914_s8, %s163_s10  }
  0x30   : > { %p1094_p1 = scmp.lt.s32.totalorder %s813_s17, 3  ;;  %p1095_p2 = scmp.ge.s32.totalorder %s813_s17, 1 }
  0x31   : > { %s571_s11 = sshll.u32 %s905_s28, 1  ;;  %s585_s18 = sshll.u32 %s809_s16, 5 }
  0x32   : > { %p954_p7 = pnand %p1095_p2, %p1094_p1  ;;  %s963_s22 = scalar_lea.hbm %s1084_s1, %s585_s18 }
  0x33   : > { %s187_s23 = scalar_lea.vmem [#allocation5], %s571_s11  ;;  %s184_s6 = scalar_lea.sflag [#allocation6], %s905_s28 }
  0x34   : > { %s1096_s7 = scalar_select %p954_p7, 1, 0 }
  0x35   : > { %s197_s29 = sshll.u32 %s187_s23, 4  ;;  %s697_s8 = scalar_lea.hbm %s963_s22, 32  ;;  %s198_s29 = int_to_ptr.vmem [resolvable:$true] %s197_s29 }
  0x36   : > { %p698_p9 = scmp.ne.s32.totalorder %s963_s22, %s697_s8  ;;  %s702_s4 = scalar_lea.hbm %s1084_s1, 64 }
  0x37   : > { %p703_p3 = scmp.lt.u32.totalorder %s963_s22, %s1084_s1  ;;  %p704_p6 = scmp.lt.u32.totalorder %s702_s4, %s697_s8 }
  0x38   : > { %p700_p11 = pnand %p698_p9, %p669_p5  ;;  %p706_p10 = scmp.lt.u32.totalorder %s697_s8, %s963_s22 }
  0x39   : > { %p705_p4 = por %p704_p6, %p703_p3 }
  0x3a   : > { %p701_p13 = pneg %p700_p11 }
  0x3b   : > { %p707_p12 = por %p706_p10, %p705_p4 }
  0x3d   : > { %p708_p1 = pnand %p707_p12, %p701_p13 }
  0x3f   : > { %711 = shalt.err (!%p708_p1)
}
  0x40   : > { %s712_s28 = scalar_lea.vmem %s198_s29, 32  ;;  %s816_s11 = smov [#allocation5]  }
  0x41   : > { %p713_p2 = scmp.ne.s32.totalorder %s198_s29, %s712_s28  ;;  %s717_s19 = sshll.u32 %s816_s11, 4  ;;  %s718_s19 = int_to_ptr.vmem [resolvable:$false] %s717_s19 }
  0x42   : > { %s719_s21 = scalar_lea.vmem %s718_s19, 64  ;;  %p720_p8 = scmp.lt.s32.totalorder %s198_s29, %s718_s19 }
  0x43   : > { %p715_p9 = pnand %p713_p2, %p669_p5  ;;  %p721_p7 = scmp.lt.s32.totalorder %s719_s21, %s712_s28 }
  0x45   : > { %p716_p11 = pneg %p715_p9  ;;  %p722_p3 = por %p721_p7, %p720_p8 }
  0x47   : > { %p723_p6 = pnand %p722_p3, %p716_p11 }
  0x49   : > { %726 = shalt.err (!%p723_p6)
}
  0x4a   : > { %599 = dma.hbm_to_vmem [thread:$0]  (!%p918_p0), %s963_s22, 32, %s198_s29, %s184_s6  }
  0x4b   : > { %p1097_p13 = scmp.ne.s32.totalorder %s1096_s7, 0 }
  0x4c   : > { %s988_s23 = sand.u32 (!%p1097_p13), 1, %s797_s13   ;;  %p1098_p5 = scmp.ne.s32.totalorder (!%p1097_p13), %s1090_s24, 0 }
  0x4d   : > { %218 = sbr.rel (%p1097_p13) target bundleno = 200 (0xc8), region = 32  ;;  %s575_s8 = sshll.u32 (!%p1097_p13), %s988_s23, 3 }
  0x4e   : > { %s221_s10 = scalar_lea.sflag (!%p1097_p13), [#allocation3], %s988_s23  ;;  %s224_s30 = scalar_lea.vmem (!%p1097_p13), [#allocation2], %s575_s8 }
  0x54   : > { %780 = dma.done.wait (%p1098_p5), %s221_s10, 128  }
  0x55   : > { %782 = vsyncadd (%p1098_p5), %s221_s10, 4294967168  ;;  %s576_s9 = sshll.u32 %s988_s23, 1  ;;  %s230_s7 = scalar_lea.sflag [#allocation6], %s988_s23 }
  0x56   : > { %s998_s22 = scalar_lea.vmem [#allocation5], %s576_s9 }
  0x57   : > { %784 = dma.done.wait (%p1098_p5), %s230_s7, 32  }
  0x58   : > { %786 = vsyncadd (%p1098_p5), %s230_s7, 4294967264  ;;  %v284_v0 = vlaneseq  ;;  %s1008_s29 = scalar_lea.vmem [#allocation7], %s576_s9  ;;  %v817_v2 = vmov 0.0   ;;  %vm293_vm1 = vcmask 1043456   ;;  %v289_v3 = vld [vmem:[%s224_s30] sm:$0xff]  ;;  %p272_p8 = scmp.lt.s32.totalorder %s805_s15, 1 }
  0x59   : > { %v291_v4 = vcombine.high %v289_v3, %v289_v3  ;;  %v294_v5 = vsel %vm293_vm1, %v289_v3, -inf  ;;  %v351_v38 = vld [vmem:[%s998_s22] sm:$0x3]  ;;  %s586_s28 = sshll.u32 %s805_s15, 5  ;;  %s442_s11 = sshll.u32 %s1008_s29, 4  ;;  %s1033_s11 = int_to_ptr.vmem [resolvable:$true] %s442_s11 }
  0x5a   : > { %vm1004_vm0 = vcmp.lt.s32.totalorder %v284_v0, 256  ;;  %v295_v6 = vrot.slane %v294_v5, 4  ;;  %vm352_vm2 = vcmp.gt.s32.totalorder %v351_v38, 0  ;;  %v357_v42 = vshrl.u32 %v284_v0, 7  ;;  %s273_s24 = scalar_select %p272_p8, %s805_s15, 1 }
  0x5b   : > { %288 = vst.msk [vmem:[%s1008_s29] sm:$0x3] %vm1004_vm0, %v817_v2  ;;  %v301_v7 = vsel %vm293_vm1, %v291_v4, -inf  ;;  %v353_v40 = vsel %vm352_vm2, %v351_v38, 0  ;;  %s1031_s8 = scalar_lea.hbm %s1086_s3, %s586_s28  ;;  %s428_s10 = scalar_lea.sflag [#allocation4], %s988_s23 }
  0x5c   : > { %v296_v8 = vmax.f32 %v294_v5, %v295_v6  ;;  %v302_v9 = vrot.slane %v301_v7, 4  ;;  %vm354_vm3 = vcmp.lt.s32.totalorder %v353_v40, 3  ;;  %v360_v48 = vsub.s32 0, %v357_v42  ;;  %s578_s6 = sshll.u32 %s273_s24, 1  ;;  %s727_s30 = scalar_lea.vmem %s1033_s11, 32 }
  0x5d   : > { %v355_v51 = vsel %vm354_vm3, %v353_v40, 3  ;;  %v364_v52 = vsub.s32 1, %v357_v42  ;;  %s278_s18 = scalar_lea.vmem %s1085_s2, %s578_s6  ;;  %p728_p0 = scmp.ne.s32.totalorder %s1033_s11, %s727_s30 }
  0x5e   : > { %v297_v10 = vrot.slane %v296_v8, 2  ;;  %v303_v11 = vmax.f32 %v301_v7, %v302_v9  ;;  %v361_v54 = vrot.slane %v355_v51, %v360_v48  ;;  %v388_v7 = vld [vmem:[%s278_s18] sm:$0x3]  ;;  %p1101_p7 = scmp.ne.s32.totalorder %s1091_s25, 0  ;;  %s819_s15 = smov [#allocation7]  }
  0x5f   : > { %v365_v57 = vrot.slane %v355_v51, %v364_v52  ;;  %s731_s9 = sshll.u32 %s819_s15, 4  ;;  %s732_s9 = int_to_ptr.vmem [resolvable:$false] %s731_s9 }
  0x60   : > { %v298_v12 = vmax.f32 %v296_v8, %v297_v10  ;;  %v304_v13 = vrot.slane %v303_v11, 2  ;;  %vm366_vm4 = vcmp.eq.s32.totalorder %v357_v42, %v361_v54  ;;  %v818_v10 = vmov 1966171168   ;;  %p729_p4 = pnand %p728_p0, %p1101_p7  ;;  %s733_s7 = scalar_lea.vmem %s732_s9, 64 }
  0x61   : > { %vm367_vm5 = vcmp.eq.s32.totalorder %v357_v42, %v365_v57  ;;  %p734_p12 = scmp.lt.s32.totalorder %s1033_s11, %s732_s9  ;;  %p735_p1 = scmp.lt.s32.totalorder %s733_s7, %s727_s30 }
  0x62   : > { %v299_v14 = vrot.slane %v298_v12, 1  ;;  %v305_v15 = vmax.f32 %v303_v11, %v304_v13  ;;  %v407_v11 = vunpack.c.l.s4 %v818_v10  ;;  %p730_p10 = pneg %p729_p4 }
  0x63   : > { %p736_p2 = por %p735_p1, %p734_p12 }
  0x64   : > { %v300_v16 = vmax.f32 %v298_v12, %v299_v14  ;;  %v306_v17 = vrot.slane %v305_v15, 1  ;;  %v393_v14 = vrot.slane %v388_v7, %v360_v48 }
  0x65   : > { %p737_p9 = pnand %p736_p2, %p730_p10 }
  0x66   : > { %v307_v18 = vmax.f32 %v305_v15, %v306_v17  ;;  %v397_v17 = vrot.slane %v388_v7, %v364_v52 }
  0x68   : > { %v310_v19 = vcombine.low %v300_v16, %v307_v18  ;;  %v408_v18 = vunpack.c.0.s8 %v407_v11 }
  0x6a   : > { %v312_v20 = vsub.f32 %v289_v3, %v310_v19 }
  0x6c   : > { %v313_v21 = vmul.f32 1.442695, %v312_v20 }
  0x6e   : > { %657 = vpow2.f32 %v313_v21 }
  0x78   : > { %v658_v22 = vpop.eup %657 }
  0x79   : > { %v316_v23 = vcombine.high %v658_v22, %v658_v22  ;;  %v318_v24 = vsel %vm293_vm1, %v658_v22, 0.0 }
  0x7a   : > { %v319_v25 = vrot.slane %v318_v24, 4 }
  0x7b   : > { %v325_v26 = vsel %vm293_vm1, %v316_v23, 0.0 }
  0x7c   : > { %v320_v27 = vadd.f32 %v319_v25, %v318_v24  ;;  %v326_v28 = vrot.slane %v325_v26, 4  ;;  %v402_v25 = vld [vmem:[%s1008_s29] sm:$0x3] }
  0x7e   : > { %v321_v29 = vrot.slane %v320_v27, 2  ;;  %v327_v30 = vadd.f32 %v326_v28, %v325_v26 }
  0x80   : > { %v322_v31 = vadd.f32 %v321_v29, %v320_v27  ;;  %v328_v32 = vrot.slane %v327_v30, 2 }
  0x82   : > { %v323_v33 = vrot.slane %v322_v31, 1  ;;  %v329_v34 = vadd.f32 %v328_v32, %v327_v30 }
  0x84   : > { %v324_v35 = vadd.f32 %v323_v33, %v322_v31  ;;  %v330_v36 = vrot.slane %v329_v34, 1 }
  0x86   : > { %v331_v37 = vadd.f32 %v330_v36, %v329_v34  ;;  %659 = vlog2.f32 %v324_v35 }
  0x87   : > { %661 = vrcp.f32 %v324_v35 }
  0x88   : > { %663 = vlog2.f32 %v331_v37 }
  0x89   : > { %665 = vrcp.f32 %v331_v37 }
  0x90   : > { %v660_v39 = vpop.eup %659 }
  0x91   : > { %v662_v41 = vpop.eup %661  ;;  %v333_v44 = vmul.f32 0.6931472, %v660_v39 }
  0x92   : > { %v664_v43 = vpop.eup %663 }
  0x93   : > { %v666_v45 = vpop.eup %665  ;;  %v335_v46 = vmul.f32 0.6931472, %v664_v43 }
  0x94   : > { %v345_v47 = vcombine.low %v662_v41, %v666_v45 }
  0x95   : > { %v338_v49 = vcombine.low %v333_v44, %v335_v46 }
  0x96   : > { %v347_v50 = vmul.f32 %v658_v22, %v345_v47  ;;  %v411_v22 = vsub.s32 %v408_v18, %v357_v42 }
  0x97   : > { %v340_v55 = vsub.f32 %v312_v20, %v338_v49 }
  0x98   : > { %v348_v53 = vsub.f32 1.0, %v347_v50 }
  0x9a   : > { %v349_v56 = vmax.f32 %v348_v53, 0.0 }
  0x9c   : > { %v350_v58 = vmul.f32 %v349_v56, %v349_v56 }
  0x9e   : > { %v368_v59 = vmul.f32 %v350_v58, %v340_v55 }
  0xa0   : > { %v370_v60 = vcombine.high %v368_v59, %v368_v59  ;;  %v372_v61 = vsel %vm366_vm4, %v368_v59, 0.0 }
  0xa1   : > { %v374_v62 = vsel %vm293_vm1, %v372_v61, 0.0 }
  0xa2   : > { %v373_v63 = vsel %vm367_vm5, %v370_v60, 0.0  ;;  %v375_v0 = vrot.slane %v374_v62, 4 }
  0xa3   : > { %v381_v2 = vsel %vm293_vm1, %v373_v63, 0.0 }
  0xa4   : > { %v376_v3 = vadd.f32 %v375_v0, %v374_v62  ;;  %v382_v4 = vrot.slane %v381_v2, 4 }
  0xa6   : > { %v377_v5 = vrot.slane %v376_v3, 2  ;;  %v383_v6 = vadd.f32 %v382_v4, %v381_v2 }
  0xa8   : > { %v378_v8 = vadd.f32 %v377_v5, %v376_v3  ;;  %v384_v9 = vrot.slane %v383_v6, 2 }
  0xaa   : > { %v379_v12 = vrot.slane %v378_v8, 1  ;;  %v385_v13 = vadd.f32 %v384_v9, %v383_v6 }
  0xac   : > { %v380_v15 = vadd.f32 %v379_v12, %v378_v8  ;;  %v386_v16 = vrot.slane %v385_v13, 1 }
  0xae   : > { %v387_v19 = vadd.f32 %v386_v16, %v385_v13  ;;  %v400_v20 = vmul.f32 %v393_v14, %v380_v15 }
  0xb0   : > { %v401_v21 = vmul.f32 %v397_v17, %v387_v19 }
  0xb2   : > { %v405_v23 = vcombine.low %v400_v20, %v401_v21 }
  0xb4   : > { %v412_v24 = vrot.slane %v405_v23, %v411_v22 }
  0xb6   : > { %v419_v26 = vrot.slane %v412_v24, %v411_v22 }
  0xb8   : > { %v421_v27 = vadd.f32 %v419_v26, %v402_v25 }
  0xba   : > { %426 = vst.msk [vmem:[%s1008_s29] sm:$0x3] %vm1004_vm0, %v421_v27 }
  0xbb   : > { %740 = shalt.err (!%p737_p9)
}
  0xbc   : > { %s741_s23 = scalar_lea.hbm %s1031_s8, 32  ;;  %s745_s24 = scalar_lea.hbm %s1086_s3, 64 }
  0xbd   : > { %p742_p11 = scmp.ne.s32.totalorder %s1031_s8, %s741_s23  ;;  %p746_p13 = scmp.lt.u32.totalorder %s1031_s8, %s1086_s3 }
  0xbe   : > { %p747_p5 = scmp.lt.u32.totalorder %s745_s24, %s741_s23  ;;  %p749_p0 = scmp.lt.u32.totalorder %s741_s23, %s1031_s8 }
  0xbf   : > { %p743_p3 = pnand %p742_p11, %p1101_p7 }
  0xc0   : > { %p748_p8 = por %p747_p5, %p746_p13 }
  0xc1   : > { %p744_p6 = pneg %p743_p3 }
  0xc2   : > { %p750_p4 = por %p749_p0, %p748_p8 }
  0xc4   : > { %p751_p10 = pnand %p750_p4, %p744_p6 }
  0xc6   : > { %754 = shalt.err (!%p751_p10)
}
  0xc7   : > { %591 = dma.vmem_to_hbm [thread:$0]  (%p1101_p7), %s1033_s11, 32, %s1031_s8, %s428_s10  }
  0xc8 PF: > { %s454_s5 = sand.u32 1, %s793_s12   ;;  %p1102_p12 = scmp.ne.s32.totalorder %s1092_s27, 0 }
  0xc9   : > { %p1103_p1 = scmp.ge.s32.totalorder %s813_s17, 2  ;;  %s455_s18 = scalar_lea.sflag [#allocation4], %s454_s5 }
  0xcb   : > { %p601_p2 = pnand %p1103_p1, %p1102_p12 }
  0xcd   : > { %788 = dma.done.wait (!%p601_p2), %s455_s18, 32  }
  0xce   : > { %790 = vsyncadd (!%p601_p2), %s455_s18, 4294967264  ;;  %s22_s17 = sadd.s32 1, %s813_s17   ;;  %s1104_s12 = smov %s797_s13 }
  0xcf   : > { %p19_p9 = scmp.ge.s32.totalorder %s22_s17, 4   ;;  %s1105_s13 = smov %s801_s14 }
  0xd0   : > { %s1106_s14 = smov %s896_s26  ;;  %s1107_s15 = smov %s809_s16 }
  0xd1   : > { %s1108_s16 = smov %s1110_s20  ;;  %21 = sbr.rel (!%p19_p9) target bundleno = 8 (0x8), region = 97 }
  0xd8   :  { %460 = vsyncpa [#allocation3], 1 }
  0xd9   :  { %462 = vsyncpa [#allocation3 + $0x1], 1 }
  0xda   :  { %463 = vsyncpa [#allocation6], 1 }
  0xdb   :  { %465 = vsyncpa [#allocation6 + $0x1], 1 }
  0xdc   :  { %466 = vsyncpa [#allocation4], 1 }
  0xdd   :  { %468 = vsyncpa [#allocation4 + $0x1], 1 }

</bundles_post_ra>
